<compile_context>
chip_gen: v5e
topology: v5e:2x2
jax: 0.10.0
libtpu: 0.0.40
codegen_flags: <defaults>
</compile_context>

<pallas_src>
import jax
import jax.numpy as jnp
from jax.experimental import pallas as pl
from jax.experimental.pallas import tpu as pltpu


_LANES = 128                 # f32 lanes per vreg row
_MAX_ROWS_PER_STEP = 4096    # 4096 rows x 32 t/row = ~128K time-steps per grid step


def _round_up(n, m):
    return ((n + m - 1) // m) * m


def _vmem_capacity_bytes():
    try:
        cap = int(pltpu.get_tpu_info().vmem_capacity_bytes)
        if cap > 0:
            return cap
    except Exception:
        pass
    return 64 * 1024 * 1024   # conservative default (v7x per-core VMEM)


# ---------------------------------------------------------------------------
# Fast path: lane-dense x view (B, T//32, 128), fused de-interleave + matmul.
# ---------------------------------------------------------------------------
def _dense_kernel(x_ref, m_ref, b_ref, o_ref):
    """One (batch-block, T-block) step.

    x_ref: (B_blk, R, 128)       lane-dense rows; lane l of row r holds
                                 x[t = G*r + l // C_in, k = l % C_in]
    m_ref: (C_out, 128, G)       constant selection/weight matrices (VMEM resident)
    b_ref: (C_out, G)            bias broadcast tiles (VMEM resident)
    o_ref: (B_blk, C_out, R, G)  output; (r, j) <-> t = G*r + j
    """
    bb, rr, _ = x_ref.shape
    c_out = o_ref.shape[1]
    g = o_ref.shape[3]
    # Collapse leading dims; free because either bb == 1 or R % 8 == 0 (guaranteed
    # by the wrapper), so no cross-tile relayout is needed.
    x2 = x_ref[...].reshape(bb * rr, _LANES)
    for c in range(c_out):
        # y[r, j] = sum_k x[t = G*r + j, k] * w[c, k].  The (128, G) selection
        # matrix performs the stride-C_in lane de-interleave and the K=C_in
        # contraction in one MXU pass: LHS has K on lanes, RHS has K on sublanes,
        # so no operand transpose/XLU relayout is emitted and T stays on lanes.
        y = jax.lax.dot_general(
            x2, m_ref[c],
            dimension_numbers=(((1,), (0,)), ((), ())),
            preferred_element_type=jnp.float32,
        )
        y = jnp.maximum(y + b_ref[c:c + 1, :], 0.0)
        o_ref[:, c, :, :] = y.reshape(bb, rr, g).astype(o_ref.dtype)


def _forward_lane_dense(x, weight, bias, vmem_limit):
    B, T, C_in = x.shape
    C_out = weight.shape[0]
    group = _LANES // C_in            # time-steps per lane-dense row (32 for C_in=4)
    T32 = T // group

    itemsize = jnp.dtype(x.dtype).itemsize
    # Double-buffered VMEM per row of `group` time-steps:
    #   x block: 128 dense lanes; out block: C_out (R, group) tiles, lane-padded.
    row_bytes = 2 * (_LANES * itemsize + C_out * _LANES * itemsize)
    budget_rows = int(0.75 * vmem_limit) // row_bytes
    budget_rows = max(8, min((budget_rows // 8) * 8, _MAX_ROWS_PER_STEP))

    if T32 >= budget_rows:
        R, B_blk = budget_rows, 1
    else:
        if B > 1 and T32 % 8 != 0 and T32 > 8:
            R = (T32 // 8) * 8        # tile T; last tile becomes a masked edge block
        else:
            R = T32
        if B > 1 and R % 8 != 0:
            B_blk = 1                 # keeps the in-kernel reshape relayout-free
        else:
            B_blk = max(1, min(B, budget_rows // max(R, 1)))
    n_b, n_t = pl.cdiv(B, B_blk), pl.cdiv(T32, R)
    if n_b * n_t == 1:
        # Give v7x megacore at least two parallel steps when the problem splits.
        if T32 >= 16:
            R = _round_up(pl.cdiv(T32, 2), 8)
            n_t = pl.cdiv(T32, R)
        elif B >= 2:
            B_blk = pl.cdiv(B, 2)
            n_b = pl.cdiv(B, B_blk)

    # Constant operands: selection/weight matrices and bias broadcast tiles.
    lanes = jnp.arange(_LANES)
    cols = jnp.arange(group)
    sel = (lanes[:, None] // C_in == cols[None, :]).astype(x.dtype)    # (128, G)
    w_cast = weight.astype(x.dtype)
    sel_w = w_cast[:, lanes % C_in][:, :, None] * sel[None]            # (C_out, 128, G)
    bias_tile = jnp.broadcast_to(bias.astype(x.dtype)[:, None], (C_out, group))

    x_view = x.reshape(B, T32, group * C_in)    # free: (B, T, C_in) is contiguous

    out4 = pl.pallas_call(
        _dense_kernel,
        out_shape=jax.ShapeDtypeStruct((B, C_out, T32, group), x.dtype),
        grid_spec=pltpu.PrefetchScalarGridSpec(
            num_scalar_prefetch=0,
            grid=(n_b, n_t),
            in_specs=[
                pl.BlockSpec((B_blk, R, group * C_in), lambda b, t: (b, t, 0)),
                pl.BlockSpec((C_out, group * C_in, group), lambda b, t: (0, 0, 0)),
                pl.BlockSpec((C_out, group), lambda b, t: (0, 0)),
            ],
            out_specs=pl.BlockSpec((B_blk, C_out, R, group),
                                   lambda b, t: (b, 0, t, 0)),
        ),
        compiler_params=pltpu.CompilerParams(
            dimension_semantics=("parallel", "parallel"),
            vmem_limit_bytes=vmem_limit,
        ),
        cost_estimate=pl.CostEstimate(
            flops=2 * B * T * C_in * C_out,
            transcendentals=0,
            bytes_accessed=B * T * (C_in + C_out) * itemsize,
        ),
    )(x_view, sel_w, bias_tile)

    # Free reshape: (B, C_out, T//G, G) and (B, C_out, T) share the same layout.
    return out4.reshape(B, C_out, T)


# ---------------------------------------------------------------------------
# Fallback path (T % 32 != 0 or T < 32): previously-reviewed row-major kernel,
# kept with bigger tiles, cdiv grid (no pad/slice) and the same compiler hints.
# ---------------------------------------------------------------------------
def _rowmajor_kernel(x_ref, w_ref, b_ref, o_ref):
    """x_ref: (1, TT, C_in); w_ref: (C_out, C_in); b_ref: (C_out, 1); o_ref: (1, C_out, TT)."""
    y = jax.lax.dot_general(
        w_ref[...], x_ref[0],
        dimension_numbers=(((1,), (1,)), ((), ())),   # contract C_in of both operands
        preferred_element_type=jnp.float32,
    )
    o_ref[0] = jnp.maximum(y + b_ref[...], 0.0).astype(o_ref.dtype)


def _forward_rowmajor(x, weight, bias, vmem_limit):
    B, T, C_in = x.shape
    C_out = weight.shape[0]
    itemsize = jnp.dtype(x.dtype).itemsize
    # (TT, C_in) input blocks pad C_in up to 128 lanes (~512 B/t for f32); out ~32 B/t.
    per_t = 2 * (_LANES * itemsize + 8 * itemsize)
    budget_t = int(0.75 * vmem_limit) // per_t
    budget_t = max(128, min((budget_t // 128) * 128, 32768))
    tile_t = T if T <= budget_t else budget_t
    n_t = pl.cdiv(T, tile_t)
    if B * n_t == 1 and T >= 256:
        tile_t = _round_up(pl.cdiv(T, 2), 128)
        n_t = pl.cdiv(T, tile_t)

    return pl.pallas_call(
        _rowmajor_kernel,
        out_shape=jax.ShapeDtypeStruct((B, C_out, T), x.dtype),
        grid_spec=pltpu.PrefetchScalarGridSpec(
            num_scalar_prefetch=0,
            grid=(B, n_t),
            in_specs=[
                pl.BlockSpec((1, tile_t, C_in), lambda b, t: (b, t, 0)),
                pl.BlockSpec((C_out, C_in), lambda b, t: (0, 0)),
                pl.BlockSpec((C_out, 1), lambda b, t: (0, 0)),
            ],
            out_specs=pl.BlockSpec((1, C_out, tile_t), lambda b, t: (b, 0, t)),
        ),
        compiler_params=pltpu.CompilerParams(
            dimension_semantics=("parallel", "parallel"),
            vmem_limit_bytes=vmem_limit,
        ),
        cost_estimate=pl.CostEstimate(
            flops=2 * B * T * C_in * C_out,
            transcendentals=0,
            bytes_accessed=B * T * (C_in + C_out) * itemsize,
        ),
    )(x, weight.astype(x.dtype), bias.astype(x.dtype).reshape(C_out, 1))


def annotate_module_forward(x, lengths, weight, bias):
    """Pallas equivalent of the module's forward compute path.

    x:       (B, T, C_in) float32
    lengths: (B,) int32 -- only recorded by the PyTorch mock, never used in compute.
    weight:  (C_out, C_in)  torch.nn.Linear weight layout
    bias:    (C_out,)
    returns  (B, C_out, T) == relu(x @ weight.T + bias).permute(0, 2, 1)
    """
    # TODO(synk): `self.forward_passed_values.append((x, lengths))` in the mock is
    # host-side Python list bookkeeping with no device-side Pallas equivalent.
    del lengths
    _, T, C_in = x.shape

    vmem_cap = _vmem_capacity_bytes()
    vmem_limit = max(16 * 2**20, min(vmem_cap // 2, 64 * 2**20))

    group = _LANES // C_in if _LANES % C_in == 0 else 0
    if group and T >= group and T % group == 0:
        return _forward_lane_dense(x, weight, bias, vmem_limit)
    return _forward_rowmajor(x, weight, bias, vmem_limit)


if __name__ == "__main__":
    key = jax.random.PRNGKey(0)
    kw, kb, k1, k2, k3 = jax.random.split(key, 5)

    C_in, C_out = 4, 3
    # Deterministic params mirroring torch.nn.Linear(4, 3): weight (C_out, C_in),
    # bias (C_out,), uniform in [-1/sqrt(C_in), 1/sqrt(C_in)].
    bound = 1.0 / (C_in ** 0.5)
    weight = jax.random.uniform(kw, (C_out, C_in), minval=-bound, maxval=bound,
                                dtype=jnp.float32)
    bias = jax.random.uniform(kb, (C_out,), minval=-bound, maxval=bound,
                              dtype=jnp.float32)

    def reference(xv):
        # Exact f32 elementwise reference (no matmul-precision ambiguity).
        y = jnp.sum(xv[:, :, None, :] * weight[None, None, :, :], axis=-1) + bias
        return jnp.transpose(jnp.maximum(y, 0.0), (0, 2, 1))

    fwd = jax.jit(annotate_module_forward)

    # Tolerance note: the in-kernel contraction runs on the MXU, which may evaluate
    # f32 at reduced (bf16-pass) input precision; with only 4 real terms and |x| < 1
    # the error stays far below 1e-2, while real layout/weight bugs are O(1).
    def check(name, B, T, k):
        xv = jax.random.uniform(k, (B, T, C_in), minval=-1.0, maxval=1.0,
                                dtype=jnp.float32)
        lens = jnp.full((B,), T, dtype=jnp.int32)
        out = fwd(xv, lens, weight, bias)
        jax.block_until_ready(out)
        assert out.shape == (B, C_out, T), (name, out.shape)
        err = float(jnp.max(jnp.abs(out - reference(xv))))
        assert err <= 1e-2, (name, err)

    # 1) Tiny shape consistent with the mock/test usage -> row-major fallback path.
    check("small", B=2, T=8, k=k1)
    # 2) Lane-dense fast path: batched rows (B_blk > 1) + T tiling with a masked
    #    edge block (T//32 = 85 is not a multiple of the 80-row tile).
    check("tiled", B=3, T=2720, k=k2)
    # 3) Lane-dense fast path, B = 1: exercises the >=2-step split for v7x megacore.
    check("single_batch", B=1, T=2048, k=k3)

    print("KERNEL_OK")
</pallas_src>

<mosaic_0001>
module attributes {stable_mosaic.version = 11 : i64} {
  func.func @_rowmajor_kernel(%arg0: i32, %arg1: i32, %arg2: memref<1x8x4xf32, #tpu.memory_space<vmem>>, %arg3: memref<3x4xf32, #tpu.memory_space<vmem>>, %arg4: memref<3x1xf32, #tpu.memory_space<vmem>>, %arg5: memref<1x3x8xf32, #tpu.memory_space<vmem>>) attributes {dimension_semantics = [#tpu.dimension_semantics<parallel>, #tpu.dimension_semantics<parallel>], iteration_bounds = array<i64: 2, 1>, scalar_prefetch = 0 : i64, scratch_operands = 0 : i64, tpu.core_type = #tpu.core_type<tc>, window_params = [{transform_indices = @transform_0, window_bounds = array<i64: 1, 8, 4>}, {pipeline_mode = #tpu.pipeline_mode<synchronous>, transform_indices = @transform_1, window_bounds = array<i64: 3, 4>}, {pipeline_mode = #tpu.pipeline_mode<synchronous>, transform_indices = @transform_2, window_bounds = array<i64: 3, 1>}, {transform_indices = @transform_3, window_bounds = array<i64: 1, 3, 8>}]} {
    %c0 = arith.constant 0 : index
    %c0_0 = arith.constant 0 : index
    %0 = vector.load %arg3[%c0, %c0_0] : memref<3x4xf32, #tpu.memory_space<vmem>>, vector<3x4xf32>
    %c0_1 = arith.constant 0 : index
    %c0_2 = arith.constant 0 : index
    %c0_3 = arith.constant 0 : index
    %1 = vector.load %arg2[%c0_1, %c0_2, %c0_3] : memref<1x8x4xf32, #tpu.memory_space<vmem>>, vector<1x8x4xf32>
    %2 = vector.shape_cast %1 : vector<1x8x4xf32> to vector<8x4xf32>
    %cst = arith.constant dense<0.000000e+00> : vector<3x8xf32>
    %3 = tpu.matmul %0, %2, %cst {dimension_numbers = #tpu.dot_dimension_numbers<[1], [1], [0], [0], [0, 0, 1, 0], [], []>} : vector<3x4xf32>, vector<8x4xf32>, vector<3x8xf32> -> vector<3x8xf32>
    %c0_4 = arith.constant 0 : index
    %c0_5 = arith.constant 0 : index
    %4 = vector.load %arg4[%c0_4, %c0_5] : memref<3x1xf32, #tpu.memory_space<vmem>>, vector<3x1xf32>
    %5 = vector.broadcast %4 : vector<3x1xf32> to vector<3x8xf32>
    %6 = arith.addf %3, %5 : vector<3x8xf32>
    %cst_6 = arith.constant 0.000000e+00 : f32
    %7 = vector.broadcast %cst_6 : f32 to vector<3x8xf32>
    %8 = arith.maximumf %6, %7 : vector<3x8xf32>
    %c0_7 = arith.constant 0 : index
    %c0_8 = arith.constant 0 : index
    %c0_9 = arith.constant 0 : index
    %9 = vector.load %arg5[%c0_7, %c0_8, %c0_9] : memref<1x3x8xf32, #tpu.memory_space<vmem>>, vector<1x3x8xf32>
    %10 = vector.shape_cast %9 : vector<1x3x8xf32> to vector<3x8xf32>
    %11 = vector.shape_cast %8 : vector<3x8xf32> to vector<1x3x8xf32>
    tpu.vector_store %arg5[%c0_7, %c0_8, %c0_9], %11 {strides = array<i32>} : memref<1x3x8xf32, #tpu.memory_space<vmem>>, vector<1x3x8xf32>,
    return
  }
  func.func @transform_0(%arg0: i32, %arg1: i32) -> (i32, i32, i32) {
    %c0_i32 = arith.constant 0 : i32
    %c0_i32_0 = arith.constant 0 : i32
    return %arg0, %arg1, %c0_i32 : i32, i32, i32
  }
  func.func @transform_1(%arg0: i32, %arg1: i32) -> (i32, i32) {
    %c0_i32 = arith.constant 0 : i32
    %c0_i32_0 = arith.constant 0 : i32
    %c0_i32_1 = arith.constant 0 : i32
    return %c0_i32, %c0_i32_0 : i32, i32
  }
  func.func @transform_2(%arg0: i32, %arg1: i32) -> (i32, i32) {
    %c0_i32 = arith.constant 0 : i32
    %c0_i32_0 = arith.constant 0 : i32
    %c0_i32_1 = arith.constant 0 : i32
    return %c0_i32, %c0_i32_0 : i32, i32
  }
  func.func @transform_3(%arg0: i32, %arg1: i32) -> (i32, i32, i32) {
    %c0_i32 = arith.constant 0 : i32
    %c0_i32_0 = arith.constant 0 : i32
    return %arg0, %c0_i32, %arg1 : i32, i32, i32
  }
}

</mosaic_0001>

<bundles_post_ra>
// kernel: annotate_module_forward.1
= control target key start
LH: loop header
LB: loop body
LE: loop exit
PB: predicated region body
PF: predicated region fallthrough
CT: control target
= control target key end

     0   :  { %s391_s12 = smov 0   ;;  %s393_s13 = smov 0   ;;  %s427_s0 = inlined_call_operand.vmem [shape: f32[2,8,4], index: 0, kind: input, shape index: {}]   ;;  %s428_s1 = inlined_call_operand.vmem [shape: f32[3,4], index: 1, kind: input, shape index: {}]   ;;  %s429_s2 = inlined_call_operand.vmem [shape: f32[3,1], index: 2, kind: input, shape index: {}]   ;;  %s430_s3 = inlined_call_operand.vmem [shape: f32[2,3,8], index: 3, kind: output, shape index: {}]  }
   0x1   :  { %s395_s14 = smov 0  }
   0x2 LB: > { %s25_s15 = sadd.s32 1, %s364_s13  ;;  %p313_p0 = scmp.ge.s32.totalorder %s368_s14, 1  ;;  %s368_s14 = sphi %s395_s14, %s13_s14   ;;  %s364_s13 = sphi %s393_s13, %s432_s13   ;;  %s360_s12 = sphi %s391_s12, %s431_s12  }
   0x3   : > { %p27_p1 = scmp.ge.s32.totalorder %s25_s15, 2  ;;  %p155_p2 = scmp.lt.s32.totalorder %s368_s14, 3 }
   0x5   : > { %s434_s15 = smov (%p27_p1, %s25_s15), 0  ;;  %p156_p3 = pnand %p313_p0, %p155_p2 }
   0x6   : > { %p183_p4 = scmp.lt.s32.totalorder (!%p156_p3), %s360_s12, 1 }
   0x7   : > { %159 = sbr.rel (%p156_p3) target bundleno = 150 (0x96), region = 32 }
   0xc   : > { %v370_v0 = vmov 0   ;;  %v199_v1 = vld [vmem:[%s429_s2] sm:$0x7]  ;;  %s436_s12 = smov (!%p183_p4, %s360_s12), 1  ;;  %vm205_vm0 = vcmask 31744   ;;  %vm233_vm1 = vcmask 59392  }
   0xd   : > { %345 = vset.pattern.permute.xlu0 %v370_v0  ;;  %s314_s18 = sshll.u32 %s436_s12, 3  ;;  %v197_v3 = vld [vmem:[%s428_s1] sm:$0x7]  ;;  %s315_s24 = sshll.u32 %s436_s12, 2 }
   0xe   : > { %202 = vperm.xlu0 %345, %v199_v1   ;;  %s189_s21 = scalar_lea.vmem %s427_s0, %s314_s18  ;;  %s196_s27 = scalar_lea.vmem %s430_s3, %s315_s24 }
   0xf   : > { %v198_v2 = vld [vmem:[%s189_s21] sm:$0xff] }
  0x10   : > { %316 = vmatpush.xpose.msk.msra.mxu0 %vm205_vm0, %v198_v2 }
  0x13   : > { %317 = vmatmul.msk.f32.vlgmr.msra.gmra.mxu0 %vm205_vm0, %v197_v3 }
  0x80   : > { %v203_v4 = vpop.permute.xlu0 %202 }
  0x90   : > { %v229_v5 = vpop.f32.mrf.mxu0 }
  0x91   : > { %v230_v6 = vadd.f32 %v229_v5, %v203_v4 }
  0x93   : > { %v232_v7 = vmax.f32 %v230_v6, 0.0 }
  0x95   : > { %234 = vst.msk [vmem:[%s196_s27] sm:$0x7] %vm233_vm1, %v232_v7 }
  0x96 PF: > { %s13_s14 = sadd.s32 1, %s368_s14   ;;  %s431_s12 = smov %s364_s13 }
  0x97   : > { %p10_p5 = scmp.ge.s32.totalorder %s13_s14, 4   ;;  %s432_s13 = smov %s434_s15 }
  0x99   :  { %12 = sbr.rel (!%p10_p5) target bundleno = 2 (0x2), region = 62 }

</bundles_post_ra>
